<compile_context>
chip_gen: v7x
topology: tpu7x:2x2x1
jax: 0.10.0
libtpu: 0.0.40
codegen_flags: <defaults>
</compile_context>

<pallas_src>
import jax
import jax.numpy as jnp
import numpy as np
from jax import lax
from jax.experimental import pallas as pl
from jax.experimental.pallas import tpu as pltpu


def _round_up(x, m):
    return ((x + m - 1) // m) * m


def _rows_per_vreg_tile(itemsize):
    # Sublane packing: f32 -> 8 rows/vreg-tile, bf16 -> 16, int8/fp8 -> 32.
    return 8 * max(1, 4 // itemsize)


def _concat_kernel(sup_ref, q_ref, out_ref):
    """out[b, s, :] = sup[s, :] + q[b, :]  (lane-dense broadcast add).

    sup_ref: (S2, DW)      resident; support values in low-F lanes, 0 elsewhere
    q_ref:   (1, Bq, DW)   query values in high-F lanes, 0 elsewhere
    out_ref: (Bq, S2, DW)  lane-dense output block, DW = D*2F
    """
    sup = sup_ref[...]                      # hoisted once: a handful of vregs
    n_rows = out_ref.shape[0]

    def body(b, carry):
        q_row = q_ref[0, pl.ds(b, 1), :]    # (1, DW)
        out_ref[b] = sup + q_row            # broadcast across the S2 sublanes
        return carry

    if n_rows <= 16:
        unroll = n_rows
    elif n_rows % 8 == 0:
        unroll = 8
    else:
        unroll = 1
    lax.fori_loop(0, n_rows, body, 0, unroll=unroll)


def concat_forward(x, n_support, n_query, n_class, *,
                   block_q=None, out_block_bytes=6 << 20):
    """Pallas equivalent of Concat.forward."""
    N, D, F = x.shape
    S2 = 2 * n_support
    n_q_total = n_class * n_query
    n_pairs = n_q_total * S2
    DW = D * 2 * F
    assert N == n_class * n_support + n_q_total, "unexpected number of samples"

    itemsize = x.dtype.itemsize
    rpt = _rows_per_vreg_tile(itemsize)
    lane_dw = _round_up(DW, 128)
    # Real (padded) VMEM bytes of one (S2, DW) tile == per-query output slice.
    per_q_out = _round_up(S2, rpt) * lane_dw * itemsize
    sup_bytes = per_q_out

    if block_q is None:
        cap = max(1, out_block_bytes // per_q_out)
        if n_q_total >= 4:
            # Keep at least ~4 grid steps so v7x's two TensorCores both get work.
            cap = min(cap, pl.cdiv(n_q_total, 4))
        cap = min(cap, n_q_total)
        # Prefer an exact divisor (no clipped boundary block) unless it would
        # shrink the block a lot; otherwise fall back to a multiple of 8.
        best_div = 1
        for d in range(cap, 0, -1):
            if n_q_total % d == 0:
                best_div = d
                break
        if best_div * 2 >= cap:
            block_q = best_div
        else:
            block_q = (cap // 8) * 8 if cap >= 8 else cap
    block_q = max(1, min(int(block_q), n_q_total))
    n_blocks = pl.cdiv(n_q_total, block_q)
    n_q_pad = n_blocks * block_q

    # ---- wrapper-side widening (O(inputs); output is S2x larger) -----------
    x_sup = x[:S2]                           # exactly the support rows torch uses
    x_q = x[n_class * n_support:]            # all query samples, in order
    # sup_wide[s, d*2F + f] = x_sup[s, d, f] if f <  F else 0
    sup_wide = jnp.concatenate([x_sup, jnp.zeros_like(x_sup)], axis=-1
                               ).reshape(S2, DW)
    # q_wide[i, d*2F + f]   = x_q[i, d, f-F] if f >= F else 0
    q_wide = jnp.concatenate([jnp.zeros_like(x_q), x_q], axis=-1
                             ).reshape(n_q_total, DW)
    if n_q_pad != n_q_total:
        q_wide = jnp.pad(q_wide, ((0, n_q_pad - n_q_total), (0, 0)))
    q3 = q_wide.reshape(n_blocks, block_q, DW)

    # ---- padding-aware VMEM accounting -> explicit limit -------------------
    out_block_b = block_q * per_q_out                          # (block_q, S2, DW)
    q_block_b = _round_up(block_q, rpt) * lane_dw * itemsize   # (1, block_q, DW)
    vmem_need = 2 * (out_block_b + q_block_b + sup_bytes)      # double-buffered
    vmem_limit = int(min(max(vmem_need + (2 << 20), 16 << 20), 56 << 20))

    out_wide = pl.pallas_call(
        _concat_kernel,
        out_shape=jax.ShapeDtypeStruct((n_q_total, S2, DW), x.dtype),
        grid_spec=pltpu.PrefetchScalarGridSpec(
            num_scalar_prefetch=0,
            grid=(n_blocks,),
            in_specs=[
                # Resident support slab: constant index_map -> fetched once.
                pl.BlockSpec((S2, DW), lambda g: (0, 0)),
                # block_q widened query rows per grid step.
                pl.BlockSpec((1, block_q, DW), lambda g: (g, 0, 0)),
            ],
            out_specs=pl.BlockSpec((block_q, S2, DW), lambda g: (g, 0, 0)),
        ),
        compiler_params=pltpu.CompilerParams(
            dimension_semantics=("parallel",),
            vmem_limit_bytes=vmem_limit,
        ),
    )(sup_wide, q3)

    # Layout-preserving (free) reshape back to the PyTorch output shape.
    return out_wide.reshape(n_pairs, D, 2 * F)


def concat_reference(x, n_support, n_query, n_class):
    """Pure-JAX reference mirroring the PyTorch loops."""
    x0 = x[:n_support]
    x1 = x[n_support:n_class * n_support]
    xq = x[n_class * n_support:]
    outs = []
    for i in range(n_class * n_query):
        for j in range(n_support):
            outs.append(jnp.concatenate([x0[j], xq[i]], axis=-1)[None])
        for j in range(n_support):
            outs.append(jnp.concatenate([x1[j], xq[i]], axis=-1)[None])
    return jnp.concatenate(outs, axis=0)


if __name__ == "__main__":
    # Small deterministic config (Concat has no learnable params).
    n_support, n_query, n_class = 2, 3, 2
    D, F = 8, 16
    N = n_class * n_support + n_class * n_query  # 10 samples

    key = jax.random.PRNGKey(0)
    x = jax.random.normal(key, (N, D, F), dtype=jnp.float32)

    out = concat_forward(x, n_support, n_query, n_class)
    out = jax.block_until_ready(out)

    ref = concat_reference(x, n_support, n_query, n_class)
    assert out.shape == (n_class * n_query * 2 * n_support, D, 2 * F), out.shape
    np.testing.assert_allclose(np.asarray(out), np.asarray(ref), rtol=0, atol=0)

    print("KERNEL_OK")
</pallas_src>

<mosaic_0001>
module attributes {stable_mosaic.version = 11 : i64} {
  func.func @_concat_kernel(%arg0: i32, %arg1: memref<4x256xf32, #tpu.memory_space<vmem>>, %arg2: memref<1x2x256xf32, #tpu.memory_space<vmem>>, %arg3: memref<2x4x256xf32, #tpu.memory_space<vmem>>) attributes {dimension_semantics = [#tpu.dimension_semantics<parallel>], iteration_bounds = array<i64: 3>, scalar_prefetch = 0 : i64, scratch_operands = 0 : i64, tpu.core_type = #tpu.core_type<tc>, window_params = [{pipeline_mode = #tpu.pipeline_mode<synchronous>, transform_indices = @transform_0, window_bounds = array<i64: 4, 256>}, {transform_indices = @transform_1, window_bounds = array<i64: 1, 2, 256>}, {transform_indices = @transform_2, window_bounds = array<i64: 2, 4, 256>}]} {
    %c0 = arith.constant 0 : index
    %c0_0 = arith.constant 0 : index
    %0 = vector.load %arg1[%c0, %c0_0] : memref<4x256xf32, #tpu.memory_space<vmem>>, vector<4x256xf32>
    %c0_i32 = arith.constant 0 : i32
    %c0_1 = arith.constant 0 : index
    %1 = arith.index_cast %c0_i32 : i32 to index
    %c0_2 = arith.constant 0 : index
    %2 = vector.load %arg2[%c0_1, %1, %c0_2] : memref<1x2x256xf32, #tpu.memory_space<vmem>>, vector<1x1x256xf32>
    %3 = vector.shape_cast %2 : vector<1x1x256xf32> to vector<1x256xf32>
    %4 = vector.broadcast %3 : vector<1x256xf32> to vector<4x256xf32>
    %5 = arith.addf %0, %4 : vector<4x256xf32>
    %6 = arith.index_cast %c0_i32 : i32 to index
    %c0_3 = arith.constant 0 : index
    %c0_4 = arith.constant 0 : index
    %7 = vector.load %arg3[%6, %c0_3, %c0_4] : memref<2x4x256xf32, #tpu.memory_space<vmem>>, vector<1x4x256xf32>
    %8 = vector.shape_cast %7 : vector<1x4x256xf32> to vector<4x256xf32>
    %9 = vector.shape_cast %5 : vector<4x256xf32> to vector<1x4x256xf32>
    tpu.vector_store %arg3[%6, %c0_3, %c0_4], %9 {strides = array<i32>} : memref<2x4x256xf32, #tpu.memory_space<vmem>>, vector<1x4x256xf32>,
    %c1_i32 = arith.constant 1 : i32
    %c0_5 = arith.constant 0 : index
    %10 = arith.index_cast %c1_i32 : i32 to index
    %c0_6 = arith.constant 0 : index
    %11 = vector.load %arg2[%c0_5, %10, %c0_6] : memref<1x2x256xf32, #tpu.memory_space<vmem>>, vector<1x1x256xf32>
    %12 = vector.shape_cast %11 : vector<1x1x256xf32> to vector<1x256xf32>
    %13 = vector.broadcast %12 : vector<1x256xf32> to vector<4x256xf32>
    %14 = arith.addf %0, %13 : vector<4x256xf32>
    %15 = arith.index_cast %c1_i32 : i32 to index
    %c0_7 = arith.constant 0 : index
    %c0_8 = arith.constant 0 : index
    %16 = vector.load %arg3[%15, %c0_7, %c0_8] : memref<2x4x256xf32, #tpu.memory_space<vmem>>, vector<1x4x256xf32>
    %17 = vector.shape_cast %16 : vector<1x4x256xf32> to vector<4x256xf32>
    %18 = vector.shape_cast %14 : vector<4x256xf32> to vector<1x4x256xf32>
    tpu.vector_store %arg3[%15, %c0_7, %c0_8], %18 {strides = array<i32>} : memref<2x4x256xf32, #tpu.memory_space<vmem>>, vector<1x4x256xf32>,
    %c2_i32 = arith.constant 2 : i32
    return
  }
  func.func @transform_0(%arg0: i32) -> (i32, i32) {
    %c0_i32 = arith.constant 0 : i32
    %c0_i32_0 = arith.constant 0 : i32
    %c0_i32_1 = arith.constant 0 : i32
    return %c0_i32, %c0_i32_0 : i32, i32
  }
  func.func @transform_1(%arg0: i32) -> (i32, i32, i32) {
    %c0_i32 = arith.constant 0 : i32
    %c0_i32_0 = arith.constant 0 : i32
    %c0_i32_1 = arith.constant 0 : i32
    return %arg0, %c0_i32, %c0_i32_0 : i32, i32, i32
  }
  func.func @transform_2(%arg0: i32) -> (i32, i32, i32) {
    %c0_i32 = arith.constant 0 : i32
    %c0_i32_0 = arith.constant 0 : i32
    %c0_i32_1 = arith.constant 0 : i32
    return %arg0, %c0_i32, %c0_i32_0 : i32, i32, i32
  }
}

</mosaic_0001>

<bundles_post_ra>
// kernel: tpu_custom_call.1
= control target key start
LH: loop header
LB: loop body
LE: loop exit
PB: predicated region body
PF: predicated region fallthrough
CT: control target
= control target key end

     0   :  { %7 = vsyncpa [#allocation3], 0  ;;  %s738_s0 = inlined_call_operand.hbm [shape: f32[4,256], index: 0, kind: input, shape index: {}]   ;;  %s739_s1 = inlined_call_operand.hbm [shape: f32[3,2,256], index: 1, kind: input, shape index: {}]   ;;  %s740_s2 = inlined_call_operand.hbm [shape: f32[6,4,256], index: 2, kind: output, shape index: {}]  }
   0x1   :  { %8 = vsyncpa [#allocation6], 0 }
   0x2   :  { %10 = vsyncpa [#allocation6 + $0x1], 0 }
   0x3   :  { %11 = vsyncpa [#allocation4], 0 }
   0x4   :  { %13 = vsyncpa [#allocation4 + $0x1], 0  ;;  %s536_s9 = smov 0   ;;  %s538_s10 = smov 0  }
   0x5   :  { %s540_s11 = smov 0   ;;  %s542_s12 = smov 0  }
   0x6 LB: > { %s557_s13 = sadd.s32 4294967295, %s514_s12   ;;  %s305_s14 = sadd.s32 4294967294, %s514_s12   ;;  %s514_s12 = sphi %s542_s12, %s763_s12   ;;  %s510_s11 = sphi %s540_s11, %s762_s11   ;;  %s506_s10 = sphi %s538_s10, %s761_s10   ;;  %s502_s9 = sphi %s536_s9, %s760_s9  }
   0x7   : > { %p60_p0 = scmp.ne.s32.totalorder %s506_s10, %s502_s9  ;;  %p741_p1 = scmp.eq.s32.totalorder %s557_s13, 0 }
   0x8   : > { %p90_p3 = scmp.eq.s32.totalorder %s305_s14, 2  ;;  %p306_p5 = scmp.ge.s32.totalorder %s514_s12, 1 }
   0x9   : > { %p566_p4 = por %p741_p1, %p60_p0  ;;  %p97_p7 = scmp.lt.s32.totalorder %s514_s12, 4 }
   0xa   : > { %p571_p6 = por %p90_p3, %p60_p0  ;;  %s516_s18 = smov [#allocation2]  }
   0xb   : > { %s744_s15 = scalar_select %p566_p4, 1, 0 }
   0xc   : > { %s745_s16 = scalar_select %p571_p6, 1, 0 }
   0xd   : > { %p576_p8 = pnand %p306_p5, %p97_p7  ;;  %s110_s19 = sshll.u32 %s516_s18, 4  ;;  %s111_s19 = int_to_ptr.vmem [resolvable:$true] %s110_s19 }
   0xe   : > { %s583_s20 = sadd.s32 1, %s514_s12   ;;  %s47_s24 = sadd.s32 1, %s510_s11 }
   0xf   : > { %s746_s17 = scalar_select %p576_p8, 1, 0 }
  0x10   : > { %p335_p9 = pneg %p576_p8  ;;  %s44_s22 = ssub.s32 %s514_s12, %s583_s20 }
  0x11   : > { %p593_p11 = scmp.eq.s32.totalorder %s44_s22, 0  ;;  %s386_s27 = scalar_lea.hbm %s738_s0, 128 }
  0x12   : > { %p587_p10 = pnand %p335_p9, %p741_p1  ;;  %p387_p13 = scmp.ne.s32.totalorder %s738_s0, %s386_s27 }
  0x13   : > { %s748_s23 = scalar_select %p593_p11, 1, 0 }
  0x14   : > { %p388_p0 = pneg %p587_p10  ;;  %p393_p7 = scmp.lt.u32.totalorder %s386_s27, %s738_s0 }
  0x16   : > { %p389_p3 = pnand %p388_p0, %p387_p13 }
  0x18   : > { %p390_p5 = pneg %p389_p3 }
  0x1a   : > { %p395_p9 = pnand %p393_p7, %p390_p5 }
  0x1c   : > { %398 = shalt.err (!%p395_p9)
}
  0x1d   : > { %s399_s4 = scalar_lea.vmem %s111_s19, 128  ;;  %p407_p6 = scmp.lt.s32.totalorder %s111_s19, %s111_s19 }
  0x1e   : > { %p400_p1 = scmp.ne.s32.totalorder %s111_s19, %s399_s4  ;;  %p408_p4 = scmp.lt.s32.totalorder %s399_s4, %s399_s4 }
  0x20   : > { %p402_p2 = pnand %p400_p1, %p388_p0  ;;  %p409_p8 = por %p408_p4, %p407_p6 }
  0x22   : > { %p403_p12 = pneg %p402_p2 }
  0x24   : > { %p410_p11 = pnand %p409_p8, %p403_p12 }
  0x26   : > { %413 = shalt.err (!%p410_p11)
}
  0x27   : > { %338 = dma.hbm_to_vmem [thread:$0]  (!%p587_p10), %s738_s0, 128, %s111_s19, [#allocation3]  }
  0x28   : > { %p749_p1 = scmp.ne.s32.totalorder %s748_s23, 0  ;;  %p55_p2 = scmp.eq.s32.totalorder %s514_s12, 0 }
  0x29   : > { %p750_p4 = scmp.ne.s32.totalorder %s510_s11, %s506_s10  ;;  %p751_p6 = scmp.eq.s32.totalorder %s557_s13, 2 }
  0x2a   : > { %s619_s7 = scalar_select %p749_p1, %s510_s11, %s47_s24  }
  0x2b   : > { %p627_p8 = por %p751_p6, %p750_p4  ;;  %p348_p11 = scmp.lt.s32.totalorder %s514_s12, 3 }
  0x2c   : > { %s121_s14 = sand.u32 1, %s510_s11   ;;  %p753_p12 = pmov %p750_p4 }
  0x2d   : > { %s309_s18 = sshll.u32 %s121_s14, 2  ;;  %s324_s21 = sshll.u32 %s514_s12, 6 }
  0x2e   : > { %p56_p13 = por %p55_p2, %p753_p12  ;;  %s640_s19 = scalar_lea.hbm %s739_s1, %s324_s21 }
  0x2f   : > { %s125_s23 = scalar_lea.vmem [#allocation5], %s309_s18  ;;  %s122_s27 = scalar_lea.sflag [#allocation6], %s121_s14 }
  0x30   : > { %s133_s24 = sshll.u32 %s125_s23, 4  ;;  %p642_p10 = pnand %p348_p11, %p56_p13  ;;  %s646_s24 = int_to_ptr.vmem [resolvable:$true] %s133_s24 }
  0x31   : > { %s414_s28 = scalar_lea.hbm %s640_s19, 64  ;;  %s419_s3 = scalar_lea.hbm %s739_s1, 192 }
  0x32   : > { %p415_p0 = scmp.ne.s32.totalorder %s640_s19, %s414_s28  ;;  %p416_p3 = pneg %p642_p10 }
  0x33   : > { %p420_p9 = scmp.lt.u32.totalorder %s640_s19, %s739_s1  ;;  %p421_p1 = scmp.lt.u32.totalorder %s419_s3, %s414_s28 }
  0x34   : > { %p417_p5 = pnand %p416_p3, %p415_p0  ;;  %p423_p4 = scmp.lt.u32.totalorder %s414_s28, %s640_s19 }
  0x35   : > { %p422_p2 = por %p421_p1, %p420_p9 }
  0x36   : > { %p418_p7 = pneg %p417_p5 }
  0x37   : > { %p424_p6 = por %p423_p4, %p422_p2 }
  0x39   : > { %p425_p11 = pnand %p424_p6, %p418_p7 }
  0x3b   : > { %428 = shalt.err (!%p425_p11)
}
  0x3c   : > { %s429_s6 = scalar_lea.vmem %s646_s24, 64  ;;  %s517_s14 = smov [#allocation5]  }
  0x3d   : > { %p430_p12 = scmp.ne.s32.totalorder %s646_s24, %s429_s6  ;;  %s434_s18 = sshll.u32 %s517_s14, 4  ;;  %s435_s18 = int_to_ptr.vmem [resolvable:$false] %s434_s18 }
  0x3e   : > { %s436_s21 = scalar_lea.vmem %s435_s18, 128  ;;  %p437_p5 = scmp.lt.s32.totalorder %s646_s24, %s435_s18 }
  0x3f   : > { %p432_p13 = pnand %p430_p12, %p416_p3  ;;  %p438_p9 = scmp.lt.s32.totalorder %s436_s21, %s429_s6 }
  0x41   : > { %p433_p0 = pneg %p432_p13  ;;  %p439_p1 = por %p438_p9, %p437_p5 }
  0x43   : > { %p440_p2 = pnand %p439_p1, %p433_p0 }
  0x45   : > { %443 = shalt.err (!%p440_p2)
}
  0x46   : > { %342 = dma.hbm_to_vmem [thread:$0]  (!%p642_p10), %s640_s19, 64, %s646_s24, %s122_s27  }
  0x47   : > { %p755_p7 = scmp.ne.s32.totalorder %s746_s17, 0 }
  0x48   : > { %p756_p3 = scmp.eq.s32.totalorder (!%p755_p7), %s557_s13, 0 }
  0x49   : > { %142 = sbr.rel (%p755_p7) target bundleno = 112 (0x70), region = 28 }
  0x50   : > { %489 = dma.done.wait (%p756_p3), [#allocation3], 128   ;;  %p757_p4 = pmov %p756_p3 }
  0x51   : > { %s680_s22 = sand.u32 1, %s506_s10   ;;  %p758_p6 = scmp.ne.s32.totalorder %s744_s15, 0 }
  0x52   : > { %491 = vsyncadd (%p757_p4), [#allocation3], 4294967168  ;;  %s314_s25 = sshll.u32 %s680_s22, 2  ;;  %s149_s23 = scalar_lea.sflag [#allocation6], %s680_s22 }
  0x53   : > { %s152_s26 = scalar_lea.vmem [#allocation5], %s314_s25 }
  0x54   : > { %493 = dma.done.wait (%p758_p6), %s149_s23, 64  }
  0x55   : > { %495 = vsyncadd (%p758_p6), %s149_s23, 4294967232  ;;  %v177_v0 = vlaneseq  ;;  %s315_s17 = sshll.u32 %s680_s22, 4  ;;  %v175_v4 = vld [vmem:[%s152_s26] ss:$2 sm:$0x3]  ;;  %v174_v8 = vld [vmem:[#allocation2] sm:$0xff] }
  0x56   : > { %v316_v7 = vld [vmem:[%s152_s26 + $0x1] ss:$2 sm:$0x3]  ;;  %s172_s19 = scalar_lea.vmem [#allocation7], %s315_s17  ;;  %s326_s15 = sshll.u32 %s557_s13, 8 }
  0x57   : > { %v178_v1 = vshrl.u32 %v177_v0, 7  ;;  %s220_s24 = sshll.u32 %s172_s19, 4  ;;  %s695_s29 = scalar_lea.hbm %s740_s2, %s326_s15  ;;  %s690_s24 = int_to_ptr.vmem [resolvable:$true] %s220_s24 }
  0x58   : > { %s206_s30 = scalar_lea.sflag [#allocation4], %s680_s22  ;;  %s444_s3 = scalar_lea.vmem %s690_s24, 256 }
  0x59   : > { %v179_v2 = vsub.s32 0, %v178_v1  ;;  %v183_v3 = vsub.s32 1, %v178_v1  ;;  %p445_p10 = scmp.ne.s32.totalorder %s690_s24, %s444_s3  ;;  %s518_s13 = smov [#allocation7]  }
  0x5a   : > { %s448_s4 = sshll.u32 %s518_s13, 4  ;;  %s449_s4 = int_to_ptr.vmem [resolvable:$false] %s448_s4 }
  0x5b   : > { %v180_v5 = vrot.slane %v175_v4, %v179_v2  ;;  %v184_v6 = vrot.slane %v175_v4, %v183_v3  ;;  %v195_v9 = vrot.slane %v316_v7, %v179_v2  ;;  %v199_v10 = vrot.slane %v316_v7, %v183_v3  ;;  %p446_p11 = pnand %p445_p10, %p627_p8  ;;  %s450_s5 = scalar_lea.vmem %s449_s4, 512 }
  0x5c   : > { %p451_p13 = scmp.lt.s32.totalorder %s690_s24, %s449_s4  ;;  %p452_p0 = scmp.lt.s32.totalorder %s450_s5, %s444_s3 }
  0x5d   : > { %v185_v11 = vcombine.low %v180_v5, %v184_v6  ;;  %v200_v12 = vcombine.low %v195_v9, %v199_v10  ;;  %p447_p12 = pneg %p446_p11 }
  0x5e   : > { %p453_p5 = por %p452_p0, %p451_p13 }
  0x5f   : > { %v187_v13 = vadd.f32 %v185_v11, %v174_v8  ;;  %v202_v14 = vadd.f32 %v200_v12, %v174_v8 }
  0x60   : > { %p454_p9 = pnand %p453_p5, %p447_p12 }
  0x61   : > { %188 = vst [vmem:[%s172_s19] sm:$0xff] %v187_v13  ;;  %317 = vst [vmem:[%s172_s19 + $0x8] sm:$0xff] %v202_v14 }
  0x62   : > { %457 = shalt.err (!%p454_p9)
}
  0x63   : > { %s458_s6 = scalar_lea.hbm %s695_s29, 256  ;;  %s462_s21 = scalar_lea.hbm %s740_s2, 768 }
  0x64   : > { %p459_p1 = scmp.ne.s32.totalorder %s695_s29, %s458_s6  ;;  %p463_p3 = scmp.lt.u32.totalorder %s695_s29, %s740_s2 }
  0x65   : > { %p464_p4 = scmp.lt.u32.totalorder %s462_s21, %s458_s6  ;;  %p466_p10 = scmp.lt.u32.totalorder %s458_s6, %s695_s29 }
  0x66   : > { %p460_p2 = pnand %p459_p1, %p627_p8 }
  0x67   : > { %p465_p6 = por %p464_p4, %p463_p3 }
  0x68   : > { %p461_p7 = pneg %p460_p2 }
  0x69   : > { %p467_p11 = por %p466_p10, %p465_p6 }
  0x6b   : > { %p468_p12 = pnand %p467_p11, %p461_p7 }
  0x6d   : > { %471 = shalt.err (!%p468_p12)
}
  0x6e   : > { %s519_s26 = smov 128   ;;  %s520_s17 = smov 8  }
  0x6f   : > { %333 = dma.vmem_to_hbm [thread:$0]  (%p627_p8), %s690_s24, 256, %s695_s29, %s206_s30, %s519_s26, %s519_s26, %s520_s17  }
  0x70 PF: > { %p350_p13 = scmp.ge.s32.totalorder %s514_s12, 2  ;;  %s235_s19 = sand.u32 1, %s502_s9  }
  0x71   : > { %p759_p0 = scmp.ne.s32.totalorder %s745_s16, 0  ;;  %s236_s15 = scalar_lea.sflag [#allocation4], %s235_s19 }
  0x73   : > { %p344_p5 = pnand %p350_p13, %p759_p0 }
  0x75   : > { %497 = dma.done.wait (!%p344_p5), %s236_s15, 256  }
  0x76   : > { %499 = vsyncadd (!%p344_p5), %s236_s15, 4294967040  ;;  %p16_p9 = scmp.ge.s32.totalorder %s583_s20, 5   ;;  %s760_s9 = smov %s506_s10 }
  0x77   : > { %s761_s10 = smov %s510_s11  ;;  %s762_s11 = smov %s619_s7 }
  0x78   : > { %s763_s12 = smov %s583_s20  ;;  %18 = sbr.rel (!%p16_p9) target bundleno = 6 (0x6), region = 80 }
  0x7f   :  { %241 = vsyncpa [#allocation3], 1 }
  0x80   :  { %243 = vsyncpa [#allocation3 + $0x1], 1 }
  0x81   :  { %244 = vsyncpa [#allocation6], 1 }
  0x82   :  { %246 = vsyncpa [#allocation6 + $0x1], 1 }
  0x83   :  { %247 = vsyncpa [#allocation4], 1 }
  0x84   :  { %249 = vsyncpa [#allocation4 + $0x1], 1 }

</bundles_post_ra>
